<compile_context>
chip_gen: v7x
topology: tpu7x:2x2x1
jax: 0.10.0
libtpu: 0.0.40
codegen_flags: <defaults>
</compile_context>

<pallas_src>
import jax
import jax.numpy as jnp
from jax import lax
from jax.experimental import pallas as pl
from jax.experimental.pallas import tpu as pltpu


# ---------------------------------------------------------------------------
# Kernels
# ---------------------------------------------------------------------------
def _linear_kernel(x_ref, w_ref, b_ref, o_ref):
    """One batch tile of y = x @ W^T + b.

    x_ref: [tile_m, in_f]   w_ref: [out_f, in_f] (PyTorch layout, untransposed)
    b_ref: [1, out_f]       o_ref: [tile_m, out_f]
    """
    y = lax.dot_general(
        x_ref[...], w_ref[...],
        dimension_numbers=(((1,), (1,)), ((), ())),   # contract last dims
        preferred_element_type=jnp.float32)
    o_ref[...] = (y + b_ref[...]).astype(o_ref.dtype)


def _linear_kernel_ktiled(x_ref, w_ref, b_ref, o_ref, acc_ref):
    """K-tiled variant (grid = (batch tiles, K tiles)) with a VMEM f32
    accumulator, for feature dims whose full weight would not fit in VMEM."""
    k = pl.program_id(1)

    @pl.when(k == 0)
    def _():
        acc_ref[...] = jnp.zeros_like(acc_ref)

    acc_ref[...] += lax.dot_general(
        x_ref[...], w_ref[...],
        dimension_numbers=(((1,), (1,)), ((), ())),
        preferred_element_type=jnp.float32)

    @pl.when(k == pl.num_programs(1) - 1)
    def _():
        o_ref[...] = (acc_ref[...] + b_ref[...]).astype(o_ref.dtype)


# ---------------------------------------------------------------------------
# Wrapper helpers
# ---------------------------------------------------------------------------
def _round_up(v, m):
    return ((v + m - 1) // m) * m


def _num_tensorcores_per_chip():
    """v7x exposes two TensorCores per chip; v5e/v6e have one."""
    try:
        kind = jax.devices()[0].device_kind.lower()
    except Exception:
        return 1
    return 2 if ("v7" in kind or "7x" in kind) else 1


def _choose_tile_m(n, in_f, out_f, num_cores):
    """Target one grid step per TensorCore (grid==2 on v7x); on single-TC
    chips use at most two steps so adjacent-step in/out DMAs overlap.  Bounded
    by a conservative double-buffered VMEM budget."""
    if n <= 16:
        return n  # full-extent tiny block (full-dim exception to the 8-rule)

    row_bytes = 4 * (in_f + out_f)                      # x row + out row, f32
    max_rows_vmem = max(8, (8 * 1024 * 1024) // (2 * row_bytes))
    max_rows = min(4096, max_rows_vmem)

    target_steps = num_cores
    if num_cores == 1 and n > 1024:
        target_steps = 2

    tile = min(pl.cdiv(n, target_steps), max_rows)
    return max(8, _round_up(tile, 8))


def _const_spec(shape):
    """BlockSpec for grid-invariant operands (weight/bias): single-buffered,
    they are fetched once rather than per grid step."""
    index_map = lambda *idx: (0,) * len(shape)
    try:
        return pl.BlockSpec(shape, index_map, pipeline_mode=pl.Buffered(1))
    except TypeError:  # older signature without pipeline_mode
        return pl.BlockSpec(shape, index_map)


# ---------------------------------------------------------------------------
# Forward pass
# ---------------------------------------------------------------------------
def linear_glorot_forward(x, weight, bias, *, k_tile=None):
    """LinearLayerGlorot.forward: y = x @ weight.T + bias.

    x: [N, in_f] f32; weight: [out_f, in_f] (PyTorch layout); bias: [out_f].
    """
    n, in_f = x.shape
    out_f, in_f_w = weight.shape
    assert in_f == in_f_w, "weight/input feature mismatch"

    b = bias.reshape(1, out_f)

    num_cores = _num_tensorcores_per_chip()
    tile_m = _choose_tile_m(n, in_f, out_f, num_cores)
    grid_m = pl.cdiv(n, tile_m)
    # NOTE: no pad/slice for ragged N.  Pallas masks stores of the partial
    # last output block; garbage rows read from the padded tail of the last x
    # block only feed output rows that are never written back.  (Each output
    # row depends only on its own input row — do NOT reuse this trick for
    # cross-row reductions.)

    cost = pl.CostEstimate(
        flops=2 * n * in_f * out_f,
        transcendentals=0,
        bytes_accessed=4 * (n * in_f + out_f * in_f + out_f + n * out_f))

    # Auto-enable K-tiling only when the full weight would stress VMEM.
    if k_tile is None and 4 * out_f * in_f > 8 * 1024 * 1024:
        for cand in (2048, 1024, 512, 256, 128):
            if in_f % cand == 0:
                k_tile = cand
                break
    # TODO(synk): very large out_f would additionally need an N-tiling axis;
    # not needed for this module's feature sizes.

    if k_tile is None or k_tile >= in_f:
        # Fused path: full weight resident in VMEM, 1 MXU matmul per tile.
        return pl.pallas_call(
            _linear_kernel,
            out_shape=jax.ShapeDtypeStruct((n, out_f), x.dtype),
            grid_spec=pltpu.PrefetchScalarGridSpec(
                num_scalar_prefetch=0,
                grid=(grid_m,),
                in_specs=[
                    pl.BlockSpec((tile_m, in_f), lambda i: (i, 0)),  # x tile
                    _const_spec((out_f, in_f)),                      # full W
                    _const_spec((1, out_f)),                         # bias
                ],
                out_specs=pl.BlockSpec((tile_m, out_f), lambda i: (i, 0)),
            ),
            compiler_params=pltpu.CompilerParams(
                dimension_semantics=("parallel",)),
            cost_estimate=cost,
        )(x, weight, b)

    # K-tiled path.
    assert in_f % k_tile == 0, "k_tile must divide in_f"
    grid_k = in_f // k_tile
    return pl.pallas_call(
        _linear_kernel_ktiled,
        out_shape=jax.ShapeDtypeStruct((n, out_f), x.dtype),
        grid_spec=pltpu.PrefetchScalarGridSpec(
            num_scalar_prefetch=0,
            grid=(grid_m, grid_k),
            in_specs=[
                pl.BlockSpec((tile_m, k_tile), lambda i, k: (i, k)),  # x tile
                pl.BlockSpec((out_f, k_tile), lambda i, k: (0, k)),   # W K-slab
                _const_spec((1, out_f)),                              # bias
            ],
            out_specs=pl.BlockSpec((tile_m, out_f), lambda i, k: (i, 0)),
            scratch_shapes=[pltpu.VMEM((tile_m, out_f), jnp.float32)],
        ),
        compiler_params=pltpu.CompilerParams(
            dimension_semantics=("parallel", "arbitrary")),
        cost_estimate=cost,
    )(x, weight, b)


# ---------------------------------------------------------------------------
# Demo / self-test
# ---------------------------------------------------------------------------
if __name__ == "__main__":
    key = jax.random.PRNGKey(0)
    kx, kw, kx2, kw2, kx3 = jax.random.split(key, 5)

    # Small shapes consistent with the module: Linear(size_in=64, size_out=128)
    # (out_f = 128 keeps output stores lane-dense).
    batch, size_in, size_out = 256, 64, 128

    x = jax.random.normal(kx, (batch, size_in), jnp.float32)

    # nn.init.xavier_normal_(W, gain=calculate_gain('relu')=sqrt(2)); zero bias.
    gain = 2.0 ** 0.5
    std = gain * (2.0 / (size_in + size_out)) ** 0.5
    weight = std * jax.random.normal(kw, (size_out, size_in), jnp.float32)
    bias = jnp.zeros((size_out,), jnp.float32)

    out = jax.block_until_ready(linear_glorot_forward(x, weight, bias))
    ref = x @ weight.T + bias
    assert out.shape == (batch, size_out)
    assert jnp.allclose(out, ref, atol=1e-4, rtol=1e-4), "mismatch vs reference"

    # Ragged batch: exercises the masked partial-last-block path (no jnp.pad /
    # out[:n] HBM round trip).
    x2 = jax.random.normal(kx2, (133, size_in), jnp.float32)
    out2 = jax.block_until_ready(linear_glorot_forward(x2, weight, bias))
    ref2 = x2 @ weight.T + bias
    assert out2.shape == (133, size_out)
    assert jnp.allclose(out2, ref2, atol=1e-4, rtol=1e-4), "ragged mismatch"

    # K-tiled accumulator path (auto-used for large feature dims), forced here
    # at a small shape so it stays covered.
    size_in2 = 256
    std2 = gain * (2.0 / (size_in2 + size_out)) ** 0.5
    x3 = jax.random.normal(kx3, (128, size_in2), jnp.float32)
    weight2 = std2 * jax.random.normal(kw2, (size_out, size_in2), jnp.float32)
    out3 = jax.block_until_ready(
        linear_glorot_forward(x3, weight2, bias, k_tile=128))
    ref3 = x3 @ weight2.T + bias
    assert jnp.allclose(out3, ref3, atol=1e-4, rtol=1e-4), "k-tiled mismatch"

    print("KERNEL_OK")
</pallas_src>

<mosaic_0001>
module attributes {stable_mosaic.version = 11 : i64} {
  func.func @_linear_kernel(%arg0: i32, %arg1: memref<256x64xf32, #tpu.memory_space<vmem>>, %arg2: memref<128x64xf32, #tpu.memory_space<vmem>>, %arg3: memref<1x128xf32, #tpu.memory_space<vmem>>, %arg4: memref<256x128xf32, #tpu.memory_space<vmem>>) attributes {dimension_semantics = [#tpu.dimension_semantics<parallel>], iteration_bounds = array<i64: 1>, scalar_prefetch = 0 : i64, scratch_operands = 0 : i64, tpu.core_type = #tpu.core_type<tc>, window_params = [{transform_indices = @transform_0, window_bounds = array<i64: 256, 64>}, {pipeline_mode = #tpu.pipeline_mode<synchronous>, transform_indices = @transform_1, window_bounds = array<i64: 128, 64>}, {pipeline_mode = #tpu.pipeline_mode<synchronous>, transform_indices = @transform_2, window_bounds = array<i64: 1, 128>}, {transform_indices = @transform_3, window_bounds = array<i64: 256, 128>}]} {
    %c0 = arith.constant 0 : index
    %c0_0 = arith.constant 0 : index
    %0 = vector.load %arg1[%c0, %c0_0] : memref<256x64xf32, #tpu.memory_space<vmem>>, vector<256x64xf32>
    %c0_1 = arith.constant 0 : index
    %c0_2 = arith.constant 0 : index
    %1 = vector.load %arg2[%c0_1, %c0_2] : memref<128x64xf32, #tpu.memory_space<vmem>>, vector<128x64xf32>
    %cst = arith.constant dense<0.000000e+00> : vector<256x128xf32>
    %2 = tpu.matmul %0, %1, %cst {dimension_numbers = #tpu.dot_dimension_numbers<[1], [1], [0], [0], [0, 0, 1, 0], [], []>} : vector<256x64xf32>, vector<128x64xf32>, vector<256x128xf32> -> vector<256x128xf32>
    %c0_3 = arith.constant 0 : index
    %c0_4 = arith.constant 0 : index
    %3 = vector.load %arg3[%c0_3, %c0_4] : memref<1x128xf32, #tpu.memory_space<vmem>>, vector<1x128xf32>
    %4 = vector.broadcast %3 : vector<1x128xf32> to vector<256x128xf32>
    %5 = arith.addf %2, %4 : vector<256x128xf32>
    %c0_5 = arith.constant 0 : index
    %c0_6 = arith.constant 0 : index
    %6 = vector.load %arg4[%c0_5, %c0_6] : memref<256x128xf32, #tpu.memory_space<vmem>>, vector<256x128xf32>
    tpu.vector_store %arg4[%c0_5, %c0_6], %5 {strides = array<i32>} : memref<256x128xf32, #tpu.memory_space<vmem>>, vector<256x128xf32>,
    return
  }
  func.func @transform_0(%arg0: i32) -> (i32, i32) {
    %c0_i32 = arith.constant 0 : i32
    %c0_i32_0 = arith.constant 0 : i32
    return %arg0, %c0_i32 : i32, i32
  }
  func.func @transform_1(%arg0: i32) -> (i32, i32) {
    %c0_i32 = arith.constant 0 : i32
    %c0_i32_0 = arith.constant 0 : i32
    %c0_i32_1 = arith.constant 0 : i32
    return %c0_i32, %c0_i32_0 : i32, i32
  }
  func.func @transform_2(%arg0: i32) -> (i32, i32) {
    %c0_i32 = arith.constant 0 : i32
    %c0_i32_0 = arith.constant 0 : i32
    %c0_i32_1 = arith.constant 0 : i32
    return %c0_i32, %c0_i32_0 : i32, i32
  }
  func.func @transform_3(%arg0: i32) -> (i32, i32) {
    %c0_i32 = arith.constant 0 : i32
    %c0_i32_0 = arith.constant 0 : i32
    return %arg0, %c0_i32 : i32, i32
  }
}

</mosaic_0001>

<bundles_post_ra>
// kernel: tpu_custom_call.1
= control target key start
LH: loop header
LB: loop body
LE: loop exit
PB: predicated region body
PF: predicated region fallthrough
CT: control target
= control target key end

     0   :  { %vm70_vm0 = vcmask 523264   ;;  %s1074_s0 = inlined_call_operand.vmem [shape: f32[256,64], index: 0, kind: input, shape index: {}]   ;;  %s1075_s1 = inlined_call_operand.vmem [shape: f32[128,64], index: 1, kind: input, shape index: {}]   ;;  %s1076_s2 = inlined_call_operand.vmem [shape: f32[1,128], index: 2, kind: input, shape index: {}]   ;;  %s1077_s3 = inlined_call_operand.hbm [shape: f32[256,128], index: 3, kind: output, shape index: {}]  }
   0x1   :  { %v47_v0 = vld [vmem:[%s1075_s1] sm:$0xff]  ;;  %v48_v1 = vld [vmem:[%s1075_s1 + $0x8] sm:$0xff]  ;;  %v49_v2 = vld [vmem:[%s1075_s1 + $0x10] sm:$0xff] }
   0x2   :  { %v665_v3 = vpack.c.bf16 %v48_v1, %v47_v0  ;;  %vm790_vm1 = vmpackc.low %vm70_vm0, %vm70_vm0  ;;  %v50_v5 = vld [vmem:[%s1075_s1 + $0x18] sm:$0xff]  ;;  %v15_v7 = vld [vmem:[%s1074_s0] sm:$0xff] }
   0x3   :  { %v671_v6 = vpack.c.bf16 %v50_v5, %v49_v2  ;;  %v51_v8 = vld [vmem:[%s1075_s1 + $0x20] sm:$0xff]  ;;  %v52_v9 = vld [vmem:[%s1075_s1 + $0x28] sm:$0xff]  ;;  %617 = vmatprep.mubr.msk.f32.mxu0 %vm70_vm0, %v15_v7  ;;  %v53_v12 = vld [vmem:[%s1075_s1 + $0x30] sm:$0xff] }
   0x4   :  { %667 = vmatprep.subr.msk.bf16.mxu0 %vm790_vm1, %v665_v3  ;;  %713 = vmatprep.subr.msk.bf16.mxu1 %vm790_vm1, %v665_v3  ;;  %v31_v10 = vld [vmem:[%s1074_s0 + $0x80] sm:$0xff]  ;;  %v677_v11 = vpack.c.bf16 %v52_v9, %v51_v8  ;;  %v54_v13 = vld [vmem:[%s1075_s1 + $0x38] sm:$0xff] }
   0x5   :  { %670 = vmatpush3.bf16.xpose.msk.msra.mxu0 %vm790_vm1, %v665_v3  ;;  %721 = vmatpush3.bf16.xpose.msk.msra.mxu1 %vm790_vm1, %v665_v3 }
   0x6   :  { %673 = vmatprep.subr.msk.bf16.mxu0 %vm790_vm1, %v671_v6  ;;  %714 = vmatprep.subr.msk.bf16.mxu1 %vm790_vm1, %v671_v6 }
   0x7   :  { %641 = vmatprep.mubr.msk.f32.mxu1 %vm70_vm0, %v31_v10 }
   0xd   :  { %676 = vmatpush3.bf16.xpose.msk.msra.mxu0 %vm790_vm1, %v671_v6  ;;  %722 = vmatpush3.bf16.xpose.msk.msra.mxu1 %vm790_vm1, %v671_v6 }
   0xe   :  { %679 = vmatprep.subr.msk.bf16.mxu0 %vm790_vm1, %v677_v11  ;;  %715 = vmatprep.subr.msk.bf16.mxu1 %vm790_vm1, %v677_v11 }
   0xf   :  { %8 = vsyncpa [#allocation3], 0  ;;  %v683_v14 = vpack.c.bf16 %v54_v13, %v53_v12  ;;  %v55_v15 = vld [vmem:[%s1075_s1 + $0x40] sm:$0xff]  ;;  %v56_v16 = vld [vmem:[%s1075_s1 + $0x48] sm:$0xff] }
  0x10   :  { %v689_v17 = vpack.c.bf16 %v56_v16, %v55_v15  ;;  %v57_v18 = vld [vmem:[%s1075_s1 + $0x50] sm:$0xff]  ;;  %v58_v19 = vld [vmem:[%s1075_s1 + $0x58] sm:$0xff]  ;;  %v59_v21 = vld [vmem:[%s1075_s1 + $0x60] sm:$0xff] }
  0x11   :  { %v695_v20 = vpack.c.bf16 %v58_v19, %v57_v18  ;;  %v60_v22 = vld [vmem:[%s1075_s1 + $0x68] sm:$0xff]  ;;  %v61_v24 = vld [vmem:[%s1075_s1 + $0x70] sm:$0xff]  ;;  %v62_v25 = vld [vmem:[%s1075_s1 + $0x78] sm:$0xff] }
  0x12   :  { %v701_v23 = vpack.c.bf16 %v60_v22, %v59_v21  ;;  %v707_v26 = vpack.c.bf16 %v62_v25, %v61_v24  ;;  %v16_v27 = vld [vmem:[%s1074_s0 + $0x8] sm:$0xff]  ;;  %v17_v29 = vld [vmem:[%s1074_s0 + $0x10] sm:$0xff]  ;;  %v18_v31 = vld [vmem:[%s1074_s0 + $0x18] sm:$0xff] }
  0x13   :  { %v32_v28 = vld [vmem:[%s1074_s0 + $0x88] sm:$0xff]  ;;  %v33_v30 = vld [vmem:[%s1074_s0 + $0x90] sm:$0xff]  ;;  %v34_v32 = vld [vmem:[%s1074_s0 + $0x98] sm:$0xff] }
  0x14   :  { %v19_v33 = vld [vmem:[%s1074_s0 + $0x20] sm:$0xff]  ;;  %v20_v35 = vld [vmem:[%s1074_s0 + $0x28] sm:$0xff]  ;;  %v21_v37 = vld [vmem:[%s1074_s0 + $0x30] sm:$0xff] }
  0x15   :  { %682 = vmatpush3.bf16.xpose.msk.msra.mxu0 %vm790_vm1, %v677_v11  ;;  %723 = vmatpush3.bf16.xpose.msk.msra.mxu1 %vm790_vm1, %v677_v11  ;;  %v35_v34 = vld [vmem:[%s1074_s0 + $0xa0] sm:$0xff]  ;;  %v36_v36 = vld [vmem:[%s1074_s0 + $0xa8] sm:$0xff]  ;;  %v37_v38 = vld [vmem:[%s1074_s0 + $0xb0] sm:$0xff] }
  0x16   :  { %685 = vmatprep.subr.msk.bf16.mxu0 %vm790_vm1, %v683_v14  ;;  %716 = vmatprep.subr.msk.bf16.mxu1 %vm790_vm1, %v683_v14  ;;  %v22_v39 = vld [vmem:[%s1074_s0 + $0x38] sm:$0xff]  ;;  %v23_v41 = vld [vmem:[%s1074_s0 + $0x40] sm:$0xff]  ;;  %v24_v43 = vld [vmem:[%s1074_s0 + $0x48] sm:$0xff] }
  0x17   :  { %v38_v40 = vld [vmem:[%s1074_s0 + $0xb8] sm:$0xff]  ;;  %v39_v42 = vld [vmem:[%s1074_s0 + $0xc0] sm:$0xff]  ;;  %v40_v44 = vld [vmem:[%s1074_s0 + $0xc8] sm:$0xff] }
  0x18   :  { %v25_v45 = vld [vmem:[%s1074_s0 + $0x50] sm:$0xff]  ;;  %v26_v47 = vld [vmem:[%s1074_s0 + $0x58] sm:$0xff]  ;;  %v27_v49 = vld [vmem:[%s1074_s0 + $0x60] sm:$0xff] }
  0x19   :  { %v41_v46 = vld [vmem:[%s1074_s0 + $0xd0] sm:$0xff]  ;;  %v42_v48 = vld [vmem:[%s1074_s0 + $0xd8] sm:$0xff]  ;;  %v43_v50 = vld [vmem:[%s1074_s0 + $0xe0] sm:$0xff] }
  0x1a   :  { %v28_v51 = vld [vmem:[%s1074_s0 + $0x68] sm:$0xff]  ;;  %v29_v53 = vld [vmem:[%s1074_s0 + $0x70] sm:$0xff]  ;;  %v30_v55 = vld [vmem:[%s1074_s0 + $0x78] sm:$0xff] }
  0x1b   :  { %v44_v52 = vld [vmem:[%s1074_s0 + $0xe8] sm:$0xff]  ;;  %v45_v54 = vld [vmem:[%s1074_s0 + $0xf0] sm:$0xff]  ;;  %v46_v56 = vld [vmem:[%s1074_s0 + $0xf8] sm:$0xff]  ;;  %s756_s0 = smov [#allocation2]  }
  0x1c   :  { %v1028_v57 = vld [vmem:[%s1076_s2] ss:$0 sm:$0xff]  ;;  %s477_s2 = sshll.u32 %s756_s0, 4  ;;  %s478_s2 = int_to_ptr.vmem [resolvable:$true] %s477_s2 }
  0x1d   :  { %688 = vmatpush3.bf16.xpose.msk.msra.mxu0 %vm790_vm1, %v683_v14  ;;  %724 = vmatpush3.bf16.xpose.msk.msra.mxu1 %vm790_vm1, %v683_v14  ;;  %s732_s26 = scalar_lea.vmem %s478_s2, 4096  ;;  %p737_p1 = scmp.lt.s32.totalorder %s478_s2, %s478_s2 }
  0x1e   :  { %691 = vmatprep.subr.msk.bf16.mxu0 %vm790_vm1, %v689_v17  ;;  %717 = vmatprep.subr.msk.bf16.mxu1 %vm790_vm1, %v689_v17  ;;  %p733_p0 = scmp.ne.s32.totalorder %s478_s2, %s732_s26  ;;  %p738_p2 = scmp.lt.s32.totalorder %s732_s26, %s732_s26 }
  0x20   :  { %p739_p3 = por %p738_p2, %p737_p1 }
  0x22   :  { %p740_p4 = pnand %p739_p3, %p733_p0 }
  0x25   :  { %694 = vmatpush3.bf16.xpose.msk.msra.mxu0 %vm790_vm1, %v689_v17  ;;  %725 = vmatpush3.bf16.xpose.msk.msra.mxu1 %vm790_vm1, %v689_v17 }
  0x26   :  { %697 = vmatprep.subr.msk.bf16.mxu0 %vm790_vm1, %v695_v20  ;;  %718 = vmatprep.subr.msk.bf16.mxu1 %vm790_vm1, %v695_v20 }
  0x2d   :  { %700 = vmatpush3.bf16.xpose.msk.msra.mxu0 %vm790_vm1, %v695_v20  ;;  %726 = vmatpush3.bf16.xpose.msk.msra.mxu1 %vm790_vm1, %v695_v20 }
  0x2e   :  { %703 = vmatprep.subr.msk.bf16.mxu0 %vm790_vm1, %v701_v23  ;;  %719 = vmatprep.subr.msk.bf16.mxu1 %vm790_vm1, %v701_v23 }
  0x35   :  { %706 = vmatpush3.bf16.xpose.msk.msra.mxu0 %vm790_vm1, %v701_v23  ;;  %727 = vmatpush3.bf16.xpose.msk.msra.mxu1 %vm790_vm1, %v701_v23 }
  0x36   :  { %709 = vmatprep.subr.msk.bf16.mxu0 %vm790_vm1, %v707_v26  ;;  %720 = vmatprep.subr.msk.bf16.mxu1 %vm790_vm1, %v707_v26 }
  0x3d   :  { %712 = vmatpush3.bf16.xpose.msk.msra.mxu0 %vm790_vm1, %v707_v26  ;;  %728 = vmatpush3.bf16.xpose.msk.msra.mxu1 %vm790_vm1, %v707_v26 }
  0x44   :  { %618 = vmatmul.mubr.msk.f32.vlgmr.msra.gmra.mrb[0].mxu0 %vm70_vm0, %v16_v27  ;;  %642 = vmatmul.mubr.msk.f32.vlgmr.msra.gmra.mrb[0].mxu1 %vm70_vm0, %v32_v28 }
  0x45   :  { %620 = vmatprep.mubr.msk.f32.mxu0 %vm70_vm0, %v17_v29  ;;  %644 = vmatprep.mubr.msk.f32.mxu1 %vm70_vm0, %v33_v30 }
  0x48   :  { %621 = vmatmul.mubr.msk.f32.gmra.mrb[2].mxu0 %vm70_vm0, %v18_v31  ;;  %645 = vmatmul.mubr.msk.f32.gmra.mrb[2].mxu1 %vm70_vm0, %v34_v32 }
  0x49   :  { %623 = vmatprep.mubr.msk.f32.mxu0 %vm70_vm0, %v19_v33  ;;  %647 = vmatprep.mubr.msk.f32.mxu1 %vm70_vm0, %v35_v34 }
  0x4c   :  { %624 = vmatmul.mubr.msk.f32.gmra.mrb[4].mxu0 %vm70_vm0, %v20_v35  ;;  %648 = vmatmul.mubr.msk.f32.gmra.mrb[4].mxu1 %vm70_vm0, %v36_v36 }
  0x4d   :  { %626 = vmatprep.mubr.msk.f32.mxu0 %vm70_vm0, %v21_v37  ;;  %650 = vmatprep.mubr.msk.f32.mxu1 %vm70_vm0, %v37_v38 }
  0x50   :  { %627 = vmatmul.mubr.msk.f32.gmra.mrb[6].mxu0 %vm70_vm0, %v22_v39  ;;  %651 = vmatmul.mubr.msk.f32.gmra.mrb[6].mxu1 %vm70_vm0, %v38_v40 }
  0x51   :  { %629 = vmatprep.mubr.msk.f32.mxu0 %vm70_vm0, %v23_v41  ;;  %653 = vmatprep.mubr.msk.f32.mxu1 %vm70_vm0, %v39_v42 }
  0x54   :  { %630 = vmatmul.mubr.msk.f32.gmra.mrb[8].mxu0 %vm70_vm0, %v24_v43  ;;  %654 = vmatmul.mubr.msk.f32.gmra.mrb[8].mxu1 %vm70_vm0, %v40_v44 }
  0x55   :  { %632 = vmatprep.mubr.msk.f32.mxu0 %vm70_vm0, %v25_v45  ;;  %656 = vmatprep.mubr.msk.f32.mxu1 %vm70_vm0, %v41_v46 }
  0x58   :  { %633 = vmatmul.mubr.msk.f32.gmra.mrb[10].mxu0 %vm70_vm0, %v26_v47  ;;  %657 = vmatmul.mubr.msk.f32.gmra.mrb[10].mxu1 %vm70_vm0, %v42_v48 }
  0x59   :  { %635 = vmatprep.mubr.msk.f32.mxu0 %vm70_vm0, %v27_v49  ;;  %659 = vmatprep.mubr.msk.f32.mxu1 %vm70_vm0, %v43_v50 }
  0x5c   :  { %636 = vmatmul.mubr.msk.f32.gmra.mrb[12].mxu0 %vm70_vm0, %v28_v51  ;;  %660 = vmatmul.mubr.msk.f32.gmra.mrb[12].mxu1 %vm70_vm0, %v44_v52 }
  0x5d   :  { %638 = vmatprep.mubr.msk.f32.mxu0 %vm70_vm0, %v29_v53  ;;  %662 = vmatprep.mubr.msk.f32.mxu1 %vm70_vm0, %v45_v54 }
  0x60   :  { %639 = vmatmul.mubr.msk.f32.gmra.mrb[14].mxu0 %vm70_vm0, %v30_v55  ;;  %663 = vmatmul.mubr.msk.f32.gmra.mrb[14].mxu1 %vm70_vm0, %v46_v56 }
 0x117   :  { %v619_v58 = vpop.f32.mrb[0].mxu0  ;;  %v643_v59 = vpop.f32.mrb[0].mxu1 }
 0x118   :  { %v287_v60 = vadd.f32 %v619_v58, %v1028_v57  ;;  %v367_v61 = vadd.f32 %v643_v59, %v1028_v57  ;;  %v281_v62 = vpop.f32.mrb[1].mxu0  ;;  %v361_v63 = vpop.f32.mrb[1].mxu1 }
 0x119   :  { %v282_v0 = vadd.f32 %v1028_v57, %v281_v62  ;;  %v362_v1 = vadd.f32 %v1028_v57, %v361_v63 }
 0x11a   :  { %441 = vst [vmem:[#allocation2 + $0x8] sm:$0xff] %v287_v60  ;;  %457 = vst [vmem:[#allocation2 + $0x88] sm:$0xff] %v367_v61 }
 0x11b   :  { %440 = vst [vmem:[#allocation2] sm:$0xff] %v282_v0  ;;  %456 = vst [vmem:[#allocation2 + $0x80] sm:$0xff] %v362_v1  ;;  %v622_v2 = vpop.f32.mrb[2].mxu0  ;;  %v646_v3 = vpop.f32.mrb[2].mxu1 }
 0x11c   :  { %v297_v4 = vadd.f32 %v622_v2, %v1028_v57  ;;  %v377_v5 = vadd.f32 %v646_v3, %v1028_v57  ;;  %v291_v6 = vpop.f32.mrb[3].mxu0  ;;  %v371_v7 = vpop.f32.mrb[3].mxu1 }
 0x11d   :  { %v292_v8 = vadd.f32 %v1028_v57, %v291_v6  ;;  %v372_v9 = vadd.f32 %v1028_v57, %v371_v7 }
 0x11e   :  { %443 = vst [vmem:[#allocation2 + $0x18] sm:$0xff] %v297_v4  ;;  %459 = vst [vmem:[#allocation2 + $0x98] sm:$0xff] %v377_v5 }
 0x11f   :  { %442 = vst [vmem:[#allocation2 + $0x10] sm:$0xff] %v292_v8  ;;  %458 = vst [vmem:[#allocation2 + $0x90] sm:$0xff] %v372_v9  ;;  %v625_v10 = vpop.f32.mrb[4].mxu0  ;;  %v649_v11 = vpop.f32.mrb[4].mxu1 }
 0x120   :  { %v307_v12 = vadd.f32 %v625_v10, %v1028_v57  ;;  %v387_v13 = vadd.f32 %v649_v11, %v1028_v57  ;;  %v301_v14 = vpop.f32.mrb[5].mxu0  ;;  %v381_v15 = vpop.f32.mrb[5].mxu1 }
 0x121   :  { %v302_v16 = vadd.f32 %v1028_v57, %v301_v14  ;;  %v382_v17 = vadd.f32 %v1028_v57, %v381_v15 }
 0x122   :  { %445 = vst [vmem:[#allocation2 + $0x28] sm:$0xff] %v307_v12  ;;  %461 = vst [vmem:[#allocation2 + $0xa8] sm:$0xff] %v387_v13 }
 0x123   :  { %444 = vst [vmem:[#allocation2 + $0x20] sm:$0xff] %v302_v16  ;;  %460 = vst [vmem:[#allocation2 + $0xa0] sm:$0xff] %v382_v17  ;;  %v628_v18 = vpop.f32.mrb[6].mxu0  ;;  %v652_v19 = vpop.f32.mrb[6].mxu1 }
 0x124   :  { %v317_v20 = vadd.f32 %v628_v18, %v1028_v57  ;;  %v397_v21 = vadd.f32 %v652_v19, %v1028_v57  ;;  %v311_v22 = vpop.f32.mrb[7].mxu0  ;;  %v391_v23 = vpop.f32.mrb[7].mxu1 }
 0x125   :  { %v312_v24 = vadd.f32 %v1028_v57, %v311_v22  ;;  %v392_v25 = vadd.f32 %v1028_v57, %v391_v23 }
 0x126   :  { %447 = vst [vmem:[#allocation2 + $0x38] sm:$0xff] %v317_v20  ;;  %463 = vst [vmem:[#allocation2 + $0xb8] sm:$0xff] %v397_v21 }
 0x127   :  { %446 = vst [vmem:[#allocation2 + $0x30] sm:$0xff] %v312_v24  ;;  %462 = vst [vmem:[#allocation2 + $0xb0] sm:$0xff] %v392_v25  ;;  %v631_v26 = vpop.f32.mrb[8].mxu0  ;;  %v655_v27 = vpop.f32.mrb[8].mxu1 }
 0x128   :  { %v327_v28 = vadd.f32 %v631_v26, %v1028_v57  ;;  %v407_v29 = vadd.f32 %v655_v27, %v1028_v57  ;;  %v321_v30 = vpop.f32.mrb[9].mxu0  ;;  %v401_v31 = vpop.f32.mrb[9].mxu1 }
 0x129   :  { %v322_v32 = vadd.f32 %v1028_v57, %v321_v30  ;;  %v402_v33 = vadd.f32 %v1028_v57, %v401_v31 }
 0x12a   :  { %449 = vst [vmem:[#allocation2 + $0x48] sm:$0xff] %v327_v28  ;;  %465 = vst [vmem:[#allocation2 + $0xc8] sm:$0xff] %v407_v29 }
 0x12b   :  { %448 = vst [vmem:[#allocation2 + $0x40] sm:$0xff] %v322_v32  ;;  %464 = vst [vmem:[#allocation2 + $0xc0] sm:$0xff] %v402_v33  ;;  %v634_v34 = vpop.f32.mrb[10].mxu0  ;;  %v658_v35 = vpop.f32.mrb[10].mxu1 }
 0x12c   :  { %v337_v36 = vadd.f32 %v634_v34, %v1028_v57  ;;  %v417_v37 = vadd.f32 %v658_v35, %v1028_v57  ;;  %v331_v38 = vpop.f32.mrb[11].mxu0  ;;  %v411_v39 = vpop.f32.mrb[11].mxu1 }
 0x12d   :  { %v332_v40 = vadd.f32 %v1028_v57, %v331_v38  ;;  %v412_v41 = vadd.f32 %v1028_v57, %v411_v39 }
 0x12e   :  { %451 = vst [vmem:[#allocation2 + $0x58] sm:$0xff] %v337_v36  ;;  %467 = vst [vmem:[#allocation2 + $0xd8] sm:$0xff] %v417_v37 }
 0x12f   :  { %450 = vst [vmem:[#allocation2 + $0x50] sm:$0xff] %v332_v40  ;;  %466 = vst [vmem:[#allocation2 + $0xd0] sm:$0xff] %v412_v41  ;;  %v637_v42 = vpop.f32.mrb[12].mxu0  ;;  %v661_v43 = vpop.f32.mrb[12].mxu1 }
 0x130   :  { %v347_v44 = vadd.f32 %v637_v42, %v1028_v57  ;;  %v427_v45 = vadd.f32 %v661_v43, %v1028_v57  ;;  %v341_v46 = vpop.f32.mrb[13].mxu0  ;;  %v421_v47 = vpop.f32.mrb[13].mxu1 }
 0x131   :  { %v342_v48 = vadd.f32 %v1028_v57, %v341_v46  ;;  %v422_v49 = vadd.f32 %v1028_v57, %v421_v47 }
 0x132   :  { %453 = vst [vmem:[#allocation2 + $0x68] sm:$0xff] %v347_v44  ;;  %469 = vst [vmem:[#allocation2 + $0xe8] sm:$0xff] %v427_v45 }
 0x133   :  { %452 = vst [vmem:[#allocation2 + $0x60] sm:$0xff] %v342_v48  ;;  %468 = vst [vmem:[#allocation2 + $0xe0] sm:$0xff] %v422_v49  ;;  %v640_v50 = vpop.f32.mrb[14].mxu0  ;;  %v664_v51 = vpop.f32.mrb[14].mxu1 }
 0x134   :  { %v357_v52 = vadd.f32 %v640_v50, %v1028_v57  ;;  %v437_v53 = vadd.f32 %v664_v51, %v1028_v57  ;;  %v351_v54 = vpop.f32.mrb[15].mxu0  ;;  %v431_v55 = vpop.f32.mrb[15].mxu1 }
 0x135   :  { %v352_v56 = vadd.f32 %v1028_v57, %v351_v54  ;;  %v432_v58 = vadd.f32 %v1028_v57, %v431_v55 }
 0x136   :  { %455 = vst [vmem:[#allocation2 + $0x78] sm:$0xff] %v357_v52  ;;  %471 = vst [vmem:[#allocation2 + $0xf8] sm:$0xff] %v437_v53 }
 0x137   :  { %454 = vst [vmem:[#allocation2 + $0x70] sm:$0xff] %v352_v56  ;;  %470 = vst [vmem:[#allocation2 + $0xf0] sm:$0xff] %v432_v58 }
 0x138   :  { %743 = shalt.err (!%p740_p4)
}
 0x139   :  { %s744_s29 = scalar_lea.hbm %s1077_s3, 4096 }
 0x13a   :  { %p745_p5 = scmp.ne.s32.totalorder %s1077_s3, %s744_s29  ;;  %p748_p6 = scmp.lt.u32.totalorder %s744_s29, %s1077_s3 }
 0x13c   :  { %p750_p7 = pnand %p748_p6, %p745_p5 }
 0x13e   :  { %753 = shalt.err (!%p750_p7)
}
 0x13f   :  { %s757_s7 = smov 128   ;;  %s758_s8 = smov 8  }
 0x140   :  { %483 = dma.vmem_to_hbm [thread:$0]  %s478_s2, 4096, %s1077_s3, [#allocation3], %s757_s7, %s757_s7, %s758_s8  }
 0x141   :  { %754 = dma.done.wait [#allocation3], 4096  }
 0x142   :  { %755 = vsyncadd [#allocation3], 4294963200 }
 0x143   :  { %487 = vsyncpa [#allocation3], 1 }

</bundles_post_ra>
